<compile_context>
chip_gen: v7x
topology: tpu7x:2x2x1
jax: 0.10.0
libtpu: 0.0.40
codegen_flags: <defaults>
</compile_context>

<pallas_src>
import functools

import jax
import jax.numpy as jnp
from jax.experimental import pallas as pl
from jax.experimental.pallas import tpu as pltpu


def _make_ema_kernel(alpha: float):
    alpha = float(alpha)

    def kernel(new_ref, ema_ref, out_ref):
        # Upcast per-vreg, blend in f32, store back in the original dtype so
        # HBM traffic stays at the input width (the actual bottleneck).
        new = new_ref[...].astype(jnp.float32)
        ema = ema_ref[...].astype(jnp.float32)
        blended = ema + alpha * (new - ema)
        out_ref[...] = jnp.where(jnp.isnan(ema), new, blended).astype(out_ref.dtype)

    return kernel


def _pick_lane_width(n: int):
    """Widest lane width (multiple of 128) that divides the element count."""
    for w in (1024, 512, 256, 128):
        if n % w == 0:
            return w
    return None


def _device_params():
    """(tile_bytes, vmem_limit_bytes, grid_axis_semantics) per TPU generation."""
    try:
        kind = jax.devices()[0].device_kind.lower()
    except Exception:  # pragma: no cover - defensive (e.g. AOT / CPU tracing)
        kind = ""
    if "v7" in kind:
        # 3.2 TB/s HBM: bigger tiles amortize the ~0.35us grid-step cost.
        # 3 slabs x 2-deep pipeline x 6 MiB = 36 MiB -> raise the scoped-VMEM
        # limit past the 32 MiB default, leaving headroom under 64 MiB physical.
        # CORE_PARALLEL shards the row-tile axis across both TensorCores.
        return 6 * 1024 * 1024, 48 * 1024 * 1024, pltpu.CORE_PARALLEL
    if "v6" in kind:
        # 3 x 2 x 4 MiB = 24 MiB fits the 32 MiB scoped-VMEM default.
        return 4 * 1024 * 1024, None, "parallel"
    # v5e / unknown: 3 x 2 x 2 MiB = 12 MiB fits the 16 MiB scoped default.
    return 2 * 1024 * 1024, None, "parallel"


def _tile_rows(rows: int, lane_w: int, itemsize: int, tile_bytes: int) -> int:
    """Row-tile sized to ~tile_bytes, aligned to the native sublane tiling."""
    # 8 sublanes for 4-byte dtypes, 16 for bf16/fp16, 32 for int8/fp8.
    align = max(8, 32 // max(int(itemsize), 1))
    tr = tile_bytes // (lane_w * itemsize)
    tr = max(align, (tr // align) * align)
    if rows <= tr:
        return rows  # single block equal to the full array dims (always legal)
    return tr        # aligned; a partial trailing grid block is masked by Pallas


@functools.partial(jax.jit, static_argnames=("alpha",), donate_argnums=(1,))
def ema_update(new_value: jax.Array, ema_state: jax.Array, alpha: float) -> jax.Array:
    """One EMA blend step. `ema_state` is donated and updated (quasi) in place.

    NaN entries in `ema_state` mean "uninitialized" and are replaced by the
    corresponding `new_value` entries (mirrors the torch.nan buffer semantics).
    """
    orig_shape = new_value.shape
    dtype = new_value.dtype
    if ema_state.dtype != dtype:
        ema_state = ema_state.astype(dtype)

    n = new_value.size
    lane_w = _pick_lane_width(int(n))
    if lane_w is None:
        # Ragged size (not a multiple of 128): a Pallas path would need pad +
        # slice copies (2-3 extra HBM passes). A fused XLA elementwise op is
        # already at the HBM roofline, so use it directly.
        new_f = new_value.astype(jnp.float32)
        ema_f = ema_state.astype(jnp.float32)
        blended = ema_f + alpha * (new_f - ema_f)
        return jnp.where(jnp.isnan(ema_f), new_f, blended).astype(dtype)

    rows = int(n) // lane_w
    new_slab = new_value.reshape(rows, lane_w)
    ema_slab = ema_state.reshape(rows, lane_w)   # bitcast of the donated buffer

    tile_bytes, vmem_limit, semantics = _device_params()
    tr = _tile_rows(rows, lane_w, dtype.itemsize, tile_bytes)
    grid = (pl.cdiv(rows, tr),)
    spec = pl.BlockSpec((tr, lane_w), lambda i: (i, 0))

    out_slab = pl.pallas_call(
        _make_ema_kernel(alpha),
        out_shape=jax.ShapeDtypeStruct((rows, lane_w), dtype),
        grid=grid,
        in_specs=[spec, spec],
        out_specs=spec,
        input_output_aliases={1: 0},  # output reuses the donated ema slab buffer
        compiler_params=pltpu.CompilerParams(
            dimension_semantics=(semantics,),
            vmem_limit_bytes=vmem_limit,
        ),
    )(new_slab, ema_slab)

    return out_slab.reshape(orig_shape)


class EMA:
    """Stateful wrapper mirroring the PyTorch module's interface."""

    def __init__(self, alpha: float = 0.1):
        self.alpha = float(alpha)
        self.ema = None  # None == uninitialized (the torch.nan scalar buffer)

    def reset(self):
        self.ema = None

    def __call__(self, new_value: jax.Array) -> jax.Array:
        if self.ema is None:
            # First call fast path: PyTorch just swaps the buffer for new_value.
            # Copy so the caller's array is never invalidated by the donation
            # performed on the next step.
            self.ema = jnp.array(new_value, copy=True)
        else:
            self.ema = ema_update(new_value, self.ema, self.alpha)
        return self.ema

    def observe(self, default=None):
        if self.ema is None and default is not None:
            return default
        return self.ema


if __name__ == "__main__":
    key = jax.random.PRNGKey(0)
    k1, k2, k3, k4 = jax.random.split(key, 4)

    # Layout: NCHW as in PyTorch (elementwise op; layout irrelevant to the math).
    x1 = jax.random.normal(k1, (2, 4, 16, 16), dtype=jnp.float32)
    x2 = jax.random.normal(k2, (2, 4, 16, 16), dtype=jnp.float32)

    ema_mod = EMA(alpha=0.1)

    # First forward: state is uninitialized -> output equals the new value.
    y1 = jax.block_until_ready(ema_mod(x1))
    assert jnp.allclose(y1, x1), "first call must pass through new_value"

    # Second forward: standard EMA blend (Pallas kernel path; state donated).
    y2 = jax.block_until_ready(ema_mod(x2))
    expected = x1 + 0.1 * (x2 - x1)
    assert jnp.allclose(y2, expected, atol=1e-6), "EMA blend mismatch"

    # bf16 path: state/IO stay bf16 in HBM, math is done in f32 inside the kernel.
    xb1 = x1.astype(jnp.bfloat16)
    xb2 = x2.astype(jnp.bfloat16)
    ema_bf = EMA(alpha=0.25)
    yb1 = jax.block_until_ready(ema_bf(xb1))
    assert jnp.array_equal(yb1, xb1), "bf16 first call must pass through"
    yb2 = jax.block_until_ready(ema_bf(xb2))
    ref_bf = (xb1.astype(jnp.float32)
              + 0.25 * (xb2.astype(jnp.float32) - xb1.astype(jnp.float32))
              ).astype(jnp.bfloat16)
    assert jnp.allclose(yb2.astype(jnp.float32), ref_bf.astype(jnp.float32),
                        atol=1e-2), "bf16 EMA blend mismatch"

    # Ragged size (105 elements, not a multiple of 128): fused-XLA fallback path.
    r1 = jax.random.normal(k3, (3, 5, 7), dtype=jnp.float32)
    r2 = jax.random.normal(k4, (3, 5, 7), dtype=jnp.float32)
    ema_r = EMA(alpha=0.3)
    z1 = jax.block_until_ready(ema_r(r1))
    assert jnp.allclose(z1, r1), "ragged first call must pass through"
    z2 = jax.block_until_ready(ema_r(r2))
    assert jnp.allclose(z2, r1 + 0.3 * (r2 - r1), atol=1e-6), "ragged EMA mismatch"

    print("KERNEL_OK")
</pallas_src>

<mosaic_0001>
module attributes {stable_mosaic.version = 11 : i64} {
  func.func @kernel(%arg0: i32, %arg1: memref<2x1024xf32, #tpu.memory_space<vmem>>, %arg2: memref<2x1024xf32, #tpu.memory_space<vmem>>, %arg3: memref<2x1024xf32, #tpu.memory_space<vmem>>) attributes {dimension_semantics = [#tpu.dimension_semantics<parallel>], iteration_bounds = array<i64: 1>, scalar_prefetch = 0 : i64, scratch_operands = 0 : i64, tpu.core_type = #tpu.core_type<tc>, window_params = [{transform_indices = @transform_0, window_bounds = array<i64: 2, 1024>}, {transform_indices = @transform_1, window_bounds = array<i64: 2, 1024>}, {transform_indices = @transform_2, window_bounds = array<i64: 2, 1024>}]} {
    %c0 = arith.constant 0 : index
    %c0_0 = arith.constant 0 : index
    %0 = vector.load %arg1[%c0, %c0_0] : memref<2x1024xf32, #tpu.memory_space<vmem>>, vector<2x1024xf32>
    %c0_1 = arith.constant 0 : index
    %c0_2 = arith.constant 0 : index
    %1 = vector.load %arg2[%c0_1, %c0_2] : memref<2x1024xf32, #tpu.memory_space<vmem>>, vector<2x1024xf32>
    %2 = arith.subf %0, %1 : vector<2x1024xf32>
    %cst = arith.constant 1.000000e-01 : f32
    %3 = vector.broadcast %cst : f32 to vector<2x1024xf32>
    %4 = arith.mulf %3, %2 : vector<2x1024xf32>
    %5 = arith.addf %1, %4 : vector<2x1024xf32>
    %6 = arith.cmpf one, %1, %1 : vector<2x1024xf32>
    %7 = arith.select %6, %0, %5 : vector<2x1024xi1>, vector<2x1024xf32>
    %c0_3 = arith.constant 0 : index
    %c0_4 = arith.constant 0 : index
    %8 = vector.load %arg3[%c0_3, %c0_4] : memref<2x1024xf32, #tpu.memory_space<vmem>>, vector<2x1024xf32>
    tpu.vector_store %arg3[%c0_3, %c0_4], %7 {strides = array<i32>} : memref<2x1024xf32, #tpu.memory_space<vmem>>, vector<2x1024xf32>,
    return
  }
  func.func @transform_0(%arg0: i32) -> (i32, i32) {
    %c0_i32 = arith.constant 0 : i32
    %c0_i32_0 = arith.constant 0 : i32
    return %arg0, %c0_i32 : i32, i32
  }
  func.func @transform_1(%arg0: i32) -> (i32, i32) {
    %c0_i32 = arith.constant 0 : i32
    %c0_i32_0 = arith.constant 0 : i32
    return %arg0, %c0_i32 : i32, i32
  }
  func.func @transform_2(%arg0: i32) -> (i32, i32) {
    %c0_i32 = arith.constant 0 : i32
    %c0_i32_0 = arith.constant 0 : i32
    return %arg0, %c0_i32 : i32, i32
  }
}

</mosaic_0001>

<bundles_post_ra>
// kernel: ema_update.1
= control target key start
LH: loop header
LB: loop body
LE: loop exit
PB: predicated region body
PF: predicated region fallthrough
CT: control target
= control target key end

     0   :  { %s64_s0 = inlined_call_operand.vmem [shape: f32[2,1024], index: 0, kind: input, shape index: {}]   ;;  %s65_s1 = inlined_call_operand.vmem [shape: f32[2,1024], index: 1, kind: input, shape index: {}, may-alias: {1,2}]   ;;  %s66_s2 = inlined_call_operand.vmem [shape: f32[2,1024], index: 2, kind: output, shape index: {}, may-alias: {1,2}]  }
   0x1   :  { %v11_v0 = vld [vmem:[%s64_s0] sm:$0xff]  ;;  %v12_v2 = vld [vmem:[%s64_s0 + $0x8] sm:$0xff] }
   0x2   :  { %v13_v1 = vld [vmem:[%s65_s1] sm:$0xff]  ;;  %v14_v4 = vld [vmem:[%s65_s1 + $0x8] sm:$0xff] }
   0x3   :  { %v15_v3 = vsub.f32 %v11_v0, %v13_v1  ;;  %v16_v5 = vsub.f32 %v12_v2, %v14_v4  ;;  %vm21_vm0 = vcmp.ne.f32.partialorder %v13_v1, %v13_v1  ;;  %vm22_vm1 = vcmp.ne.f32.partialorder %v14_v4, %v14_v4 }
   0x5   :  { %v17_v6 = vmul.f32 0.1, %v15_v3  ;;  %v18_v7 = vmul.f32 0.1, %v16_v5 }
   0x7   :  { %v19_v8 = vadd.f32 %v17_v6, %v13_v1  ;;  %v20_v9 = vadd.f32 %v18_v7, %v14_v4 }
   0x9   :  { %v23_v10 = vsel %vm21_vm0, %v11_v0, %v19_v8  ;;  %v24_v11 = vsel %vm22_vm1, %v12_v2, %v20_v9 }
   0xa   :  { %25 = vst [vmem:[%s66_s2] sm:$0xff] %v23_v10  ;;  %26 = vst [vmem:[%s66_s2 + $0x8] sm:$0xff] %v24_v11 }

</bundles_post_ra>
